<compile_context>
chip_gen: v5e
topology: v5e:2x2
jax: 0.10.0
libtpu: 0.0.40
codegen_flags: <defaults>
</compile_context>

<pallas_src>
import functools

import jax
import jax.numpy as jnp
from jax.experimental import pallas as pl
from jax.experimental.pallas import tpu as pltpu


def _round_up(x, m):
    return ((x + m - 1) // m) * m


def _conv_kernel(x_ref, w_ref, *rest, kh, kw, s, tm, owp, use_bigk):
    """One (batch, output-row-tile) step.

    x_ref: (s*s, tm + halo, r_wp, cin)    operand dtype (phase-decomposed tile)
    w_ref: (kh*kw*cin, coutp) if use_bigk else (kh*kw, cin, coutp)
    b_ref: (1, coutp) f32                 (optional)
    o_ref: (tm*owp, coutp)                output dtype (lane-dense slab)
    """
    if len(rest) == 2:
        b_ref, o_ref = rest
    else:
        (o_ref,) = rest
        b_ref = None
    cin = x_ref.shape[-1]
    coutp = o_ref.shape[-1]
    m = tm * owp

    # Hoist phase reads (each phase is loaded from VMEM exactly once) and the
    # column shifts (each distinct (phase, dj) sublane shift is done once and
    # shared by every kernel row i that needs it).
    phase_cache = {}

    def phase_val(p):
        if p not in phase_cache:
            phase_cache[p] = x_ref[p]                      # (tm+halo, r_wp, cin)
        return phase_cache[p]

    shift_cache = {}

    def col_window(p, dj):
        if (p, dj) not in shift_cache:
            shift_cache[(p, dj)] = phase_val(p)[:, dj:dj + owp, :]
        return shift_cache[(p, dj)]

    def tap(i, j):
        di, pi = divmod(i, s)
        dj, pj = divmod(j, s)
        # Row slice is on the leading (un-tiled) axis -> free.
        return col_window(pi * s + pj, dj)[di:di + tm]     # (tm, owp, cin)

    if use_bigk:
        # One big-K matmul: K = kh*kw*cin; accumulation stays inside the MXU.
        cols = [tap(i, j) for i in range(kh) for j in range(kw)]
        a = cols[0] if len(cols) == 1 else jnp.concatenate(cols, axis=-1)
        a = a.reshape(m, kh * kw * cin)     # owp % 8 == 0 -> tile-aligned merge
        acc = jnp.dot(a, w_ref[...], preferred_element_type=jnp.float32)
    else:
        # cin >= 128: K already saturates the MXU; per-tap dots, f32 accumulator.
        acc = jnp.zeros((m, coutp), jnp.float32)
        for i in range(kh):
            for j in range(kw):
                a = tap(i, j).reshape(m, cin)
                acc = acc + jnp.dot(a, w_ref[i * kw + j],
                                    preferred_element_type=jnp.float32)

    if b_ref is not None:
        acc = acc + b_ref[...]                             # (1, coutp) broadcast
    o_ref[...] = acc.astype(o_ref.dtype)


def conv_fixed_padding(x_nchw, weight, bias=None, *, stride=1,
                       operand_dtype=jnp.bfloat16, out_dtype=jnp.float32):
    """nn.Conv2d(cin, cout, k, stride, padding=(k-1)//2, bias) forward.

    x_nchw: (N, Cin, H, W); weight: (Cout, Cin, KH, KW); bias: optional (Cout,).
    Returns (N, Cout, OH, OW) in out_dtype (accumulation is always f32).
    """
    n, cin, h, w = map(int, x_nchw.shape)
    cout, cin_w, kh, kw = map(int, weight.shape)
    assert cin == cin_w, (cin, cin_w)
    s = int(stride)
    pad_h, pad_w = (kh - 1) // 2, (kw - 1) // 2
    oh = (h + 2 * pad_h - kh) // s + 1
    ow = (w + 2 * pad_w - kw) // s + 1
    assert oh >= 1 and ow >= 1

    ss = s * s
    owp = _round_up(ow, 8)                 # sublane-aligned output columns
    coutp = _round_up(cout, 128)           # lane-dense MXU N / output store
    halo_h = (kh - 1) // s                 # extra phase rows a row-tile needs
    max_dj = (kw - 1) // s
    r_wp = _round_up(owp + max_dj, 8)      # phase columns (tile-aligned)
    kkc = kh * kw * cin
    use_bigk = (kh * kw == 1) or (kkc <= 1024)

    x_bytes = jnp.dtype(operand_dtype).itemsize
    o_bytes = jnp.dtype(out_dtype).itemsize

    # Output-row tile TM: target M = TM*owp ~ 512 (two 256-wide MXU row groups
    # on v6e/v7x), shrink until the per-step blocks are comfortably small.
    def _block_bytes(tm_):
        b_in = ss * (tm_ + halo_h) * r_wp * cin * x_bytes
        b_out = tm_ * owp * coutp * o_bytes
        b_acc = tm_ * owp * coutp * 4
        b_col = tm_ * owp * kkc * x_bytes if use_bigk else 0
        return 2 * b_in + 2 * b_out + b_acc + b_col

    tm = max(1, min(oh, -(-512 // owp)))
    while tm > 1 and _block_bytes(tm) > (8 << 20):
        tm = (tm + 1) // 2
    nt = -(-oh // tm)                      # number of output-row tiles

    # ---- wrapper-side layout: NCHW -> NHWC, cast, spatial zero padding.
    x = jnp.transpose(x_nchw, (0, 2, 3, 1)).astype(operand_dtype)
    xp = jnp.pad(x, ((0, 0), (pad_h, pad_h), (pad_w, pad_w), (0, 0)))
    hp, wp_ = h + 2 * pad_h, w + 2 * pad_w

    r_hp = nt * tm + halo_h
    th, tw = s * r_hp, s * r_wp
    xp = xp[:, :min(hp, th), :min(wp_, tw), :]
    xp = jnp.pad(xp, ((0, 0), (0, th - xp.shape[1]), (0, tw - xp.shape[2]),
                      (0, 0)))
    if s == 1:
        phases = xp[:, None]                               # (n,1,r_hp,r_wp,cin)
    else:
        # xp[:, r*s+pi, c*s+pj, :] -> phases[:, pi*s+pj, r, c, :]; a single
        # same-size relayout (no im2col amplification).  Every tap then reads
        # an unstrided, statically-offset window of one phase in the kernel.
        phases = (xp.reshape(n, r_hp, s, r_wp, s, cin)
                    .transpose(0, 2, 4, 1, 3, 5)
                    .reshape(n, ss, r_hp, r_wp, cin))

    # Pre-tile output rows; halo rows are duplicated across neighbouring tiles
    # (halo_h/tm extra bytes) so every grid step reads a plain non-overlapping
    # block and the pipeline prefetches step i+1 while computing step i.
    if nt == 1:
        tiles = phases[:, None]
    else:
        tiles = jnp.stack(
            [phases[:, :, t * tm: t * tm + tm + halo_h] for t in range(nt)],
            axis=1)
    tiles = tiles.reshape(n * nt, ss, tm + halo_h, r_wp, cin)

    # ---- weights / bias: channel-padded to coutp lanes, resident in VMEM.
    w_hwio = jnp.pad(jnp.transpose(weight, (2, 3, 1, 0)),
                     ((0, 0), (0, 0), (0, 0), (0, coutp - cout)))
    if use_bigk:
        w_op = w_hwio.reshape(kkc, coutp).astype(operand_dtype)
        w_spec = pl.BlockSpec((kkc, coutp), lambda bt: (0, 0),
                              pipeline_mode=pl.Buffered(1))
    else:
        w_op = w_hwio.reshape(kh * kw, cin, coutp).astype(operand_dtype)
        w_spec = pl.BlockSpec((kh * kw, cin, coutp), lambda bt: (0, 0, 0),
                              pipeline_mode=pl.Buffered(1))

    inputs = [tiles, w_op]
    in_specs = [
        pl.BlockSpec((None, ss, tm + halo_h, r_wp, cin),
                     lambda bt: (bt, 0, 0, 0, 0)),
        w_spec,
    ]
    if bias is not None:
        b_op = jnp.zeros((1, coutp), jnp.float32)
        b_op = b_op.at[0, :cout].set(jnp.asarray(bias, jnp.float32))
        inputs.append(b_op)
        in_specs.append(pl.BlockSpec((1, coutp), lambda bt: (0, 0),
                                     pipeline_mode=pl.Buffered(1)))

    flops = 2 * n * oh * ow * kh * kw * cin * cout
    bytes_accessed = (tiles.size * x_bytes + w_op.size * x_bytes
                      + (coutp * 4 if bias is not None else 0)
                      + n * nt * tm * owp * coutp * o_bytes)
    vmem_limit = int(min(max(_block_bytes(tm) + w_op.size * x_bytes
                             + coutp * 4 + (4 << 20), 32 << 20), 64 << 20))

    y = pl.pallas_call(
        functools.partial(_conv_kernel, kh=kh, kw=kw, s=s, tm=tm, owp=owp,
                          use_bigk=use_bigk),
        out_shape=jax.ShapeDtypeStruct((n * nt, tm * owp, coutp), out_dtype),
        grid_spec=pltpu.PrefetchScalarGridSpec(
            num_scalar_prefetch=0,
            grid=(n * nt,),
            in_specs=in_specs,
            out_specs=pl.BlockSpec((None, tm * owp, coutp),
                                   lambda bt: (bt, 0, 0)),
        ),
        compiler_params=pltpu.CompilerParams(
            dimension_semantics=("parallel",),
            vmem_limit_bytes=vmem_limit),
        cost_estimate=pl.CostEstimate(flops=int(flops), transcendentals=0,
                                      bytes_accessed=int(bytes_accessed)),
    )(*inputs)

    # (n*nt, tm*owp, coutp) -> NHWC; row/col/channel padding is dropped by a
    # slice that fuses into the NHWC -> NCHW transpose below.
    y = y.reshape(n, nt * tm, owp, coutp)[:, :oh, :ow, :cout]
    return jnp.transpose(y, (0, 3, 1, 2))


def _reference(x, wgt, bias, stride, operand_dtype=jnp.bfloat16):
    """XLA conv on identically-cast operands, f32 accumulation."""
    _, _, kh, kw = wgt.shape
    pad_h, pad_w = (kh - 1) // 2, (kw - 1) // 2
    ref = jax.lax.conv_general_dilated(
        x.astype(operand_dtype), wgt.astype(operand_dtype),
        window_strides=(stride, stride),
        padding=((pad_h, pad_h), (pad_w, pad_w)),
        dimension_numbers=("NCHW", "OIHW", "NCHW"),
        preferred_element_type=jnp.float32)
    if bias is not None:
        ref = ref + bias.astype(jnp.float32)[None, :, None, None]
    return ref


if __name__ == "__main__":
    configs = [
        # (N, CIN, H, W, COUT, K, STRIDE, bias)
        (2, 4, 16, 16, 8, 3, 2, False),   # ResNet-style strided conv, big-K path
        (1, 8, 32, 32, 16, 3, 1, True),   # stride-1 bypass, row tiling, bias
        (1, 128, 8, 8, 32, 3, 1, False),  # cin >= 128 -> per-tap MXU path
    ]
    key = jax.random.PRNGKey(0)
    for (N, CIN, H, W, COUT, K, STRIDE, USE_BIAS) in configs:
        key, kx, kwt, kb = jax.random.split(key, 4)
        x = jax.random.normal(kx, (N, CIN, H, W), jnp.float32)
        fan_in = CIN * K * K
        wgt = (jax.random.normal(kwt, (COUT, CIN, K, K), jnp.float32)
               / jnp.sqrt(jnp.float32(fan_in)))
        b = jax.random.normal(kb, (COUT,), jnp.float32) if USE_BIAS else None

        fwd = jax.jit(functools.partial(conv_fixed_padding, stride=STRIDE))
        out = jax.block_until_ready(fwd(x, wgt, b))

        pad = (K - 1) // 2
        oh = (H + 2 * pad - K) // STRIDE + 1
        ow = (W + 2 * pad - K) // STRIDE + 1
        assert out.shape == (N, COUT, oh, ow), (out.shape, (N, COUT, oh, ow))
        assert bool(jnp.all(jnp.isfinite(out)))

        ref = _reference(x, wgt, b, STRIDE)
        max_err = float(jnp.max(jnp.abs(out - ref)))
        assert bool(jnp.allclose(out, ref, rtol=2e-2, atol=2e-2)), (
            (N, CIN, H, W, COUT, K, STRIDE, USE_BIAS), max_err)

    print("KERNEL_OK")
</pallas_src>

<mosaic_0001>
module attributes {stable_mosaic.version = 11 : i64} {
  func.func @_conv_kernel(%arg0: i32, %arg1: memref<1x4x9x16x4xbf16, #tpu.memory_space<vmem>>, %arg2: memref<36x128xbf16, #tpu.memory_space<vmem>>, %arg3: memref<1x64x128xf32, #tpu.memory_space<vmem>>) attributes {dimension_semantics = [#tpu.dimension_semantics<parallel>], iteration_bounds = array<i64: 2>, scalar_prefetch = 0 : i64, scratch_operands = 0 : i64, tpu.core_type = #tpu.core_type<tc>, window_params = [{transform_indices = @transform_0, window_bounds = array<i64: 1, 4, 9, 16, 4>}, {pipeline_mode = #tpu.pipeline_mode<synchronous>, transform_indices = @transform_1, window_bounds = array<i64: 36, 128>}, {transform_indices = @transform_2, window_bounds = array<i64: 1, 64, 128>}]} {
    %c0 = arith.constant 0 : index
    %c0_0 = arith.constant 0 : index
    %c0_1 = arith.constant 0 : index
    %c0_2 = arith.constant 0 : index
    %c0_3 = arith.constant 0 : index
    %0 = vector.load %arg1[%c0, %c0_0, %c0_1, %c0_2, %c0_3] : memref<1x4x9x16x4xbf16, #tpu.memory_space<vmem>>, vector<1x1x9x16x4xbf16>
    %1 = vector.shape_cast %0 : vector<1x1x9x16x4xbf16> to vector<9x16x4xbf16>
    %2 = vector.extract_strided_slice %1 {offsets = [0, 0, 0], sizes = [9, 8, 4], strides = [1, 1, 1]} : vector<9x16x4xbf16> to vector<9x8x4xbf16>
    %3 = vector.extract_strided_slice %2 {offsets = [0, 0, 0], sizes = [8, 8, 4], strides = [1, 1, 1]} : vector<9x8x4xbf16> to vector<8x8x4xbf16>
    %c0_4 = arith.constant 0 : index
    %c1 = arith.constant 1 : index
    %c0_5 = arith.constant 0 : index
    %c0_6 = arith.constant 0 : index
    %c0_7 = arith.constant 0 : index
    %4 = vector.load %arg1[%c0_4, %c1, %c0_5, %c0_6, %c0_7] : memref<1x4x9x16x4xbf16, #tpu.memory_space<vmem>>, vector<1x1x9x16x4xbf16>
    %5 = vector.shape_cast %4 : vector<1x1x9x16x4xbf16> to vector<9x16x4xbf16>
    %6 = vector.extract_strided_slice %5 {offsets = [0, 0, 0], sizes = [9, 8, 4], strides = [1, 1, 1]} : vector<9x16x4xbf16> to vector<9x8x4xbf16>
    %7 = vector.extract_strided_slice %6 {offsets = [0, 0, 0], sizes = [8, 8, 4], strides = [1, 1, 1]} : vector<9x8x4xbf16> to vector<8x8x4xbf16>
    %8 = vector.extract_strided_slice %1 {offsets = [0, 1, 0], sizes = [9, 8, 4], strides = [1, 1, 1]} : vector<9x16x4xbf16> to vector<9x8x4xbf16>
    %9 = vector.extract_strided_slice %8 {offsets = [0, 0, 0], sizes = [8, 8, 4], strides = [1, 1, 1]} : vector<9x8x4xbf16> to vector<8x8x4xbf16>
    %c0_8 = arith.constant 0 : index
    %c2 = arith.constant 2 : index
    %c0_9 = arith.constant 0 : index
    %c0_10 = arith.constant 0 : index
    %c0_11 = arith.constant 0 : index
    %10 = vector.load %arg1[%c0_8, %c2, %c0_9, %c0_10, %c0_11] : memref<1x4x9x16x4xbf16, #tpu.memory_space<vmem>>, vector<1x1x9x16x4xbf16>
    %11 = vector.shape_cast %10 : vector<1x1x9x16x4xbf16> to vector<9x16x4xbf16>
    %12 = vector.extract_strided_slice %11 {offsets = [0, 0, 0], sizes = [9, 8, 4], strides = [1, 1, 1]} : vector<9x16x4xbf16> to vector<9x8x4xbf16>
    %13 = vector.extract_strided_slice %12 {offsets = [0, 0, 0], sizes = [8, 8, 4], strides = [1, 1, 1]} : vector<9x8x4xbf16> to vector<8x8x4xbf16>
    %c0_12 = arith.constant 0 : index
    %c3 = arith.constant 3 : index
    %c0_13 = arith.constant 0 : index
    %c0_14 = arith.constant 0 : index
    %c0_15 = arith.constant 0 : index
    %14 = vector.load %arg1[%c0_12, %c3, %c0_13, %c0_14, %c0_15] : memref<1x4x9x16x4xbf16, #tpu.memory_space<vmem>>, vector<1x1x9x16x4xbf16>
    %15 = vector.shape_cast %14 : vector<1x1x9x16x4xbf16> to vector<9x16x4xbf16>
    %16 = vector.extract_strided_slice %15 {offsets = [0, 0, 0], sizes = [9, 8, 4], strides = [1, 1, 1]} : vector<9x16x4xbf16> to vector<9x8x4xbf16>
    %17 = vector.extract_strided_slice %16 {offsets = [0, 0, 0], sizes = [8, 8, 4], strides = [1, 1, 1]} : vector<9x8x4xbf16> to vector<8x8x4xbf16>
    %18 = vector.extract_strided_slice %11 {offsets = [0, 1, 0], sizes = [9, 8, 4], strides = [1, 1, 1]} : vector<9x16x4xbf16> to vector<9x8x4xbf16>
    %19 = vector.extract_strided_slice %18 {offsets = [0, 0, 0], sizes = [8, 8, 4], strides = [1, 1, 1]} : vector<9x8x4xbf16> to vector<8x8x4xbf16>
    %20 = vector.extract_strided_slice %2 {offsets = [1, 0, 0], sizes = [8, 8, 4], strides = [1, 1, 1]} : vector<9x8x4xbf16> to vector<8x8x4xbf16>
    %21 = vector.extract_strided_slice %6 {offsets = [1, 0, 0], sizes = [8, 8, 4], strides = [1, 1, 1]} : vector<9x8x4xbf16> to vector<8x8x4xbf16>
    %22 = vector.extract_strided_slice %8 {offsets = [1, 0, 0], sizes = [8, 8, 4], strides = [1, 1, 1]} : vector<9x8x4xbf16> to vector<8x8x4xbf16>
    %23 = tpu.concatenate %3, %7, %9, %13, %17, %19, %20, %21, %22 in 2 : vector<8x8x4xbf16>, vector<8x8x4xbf16>, vector<8x8x4xbf16>, vector<8x8x4xbf16>, vector<8x8x4xbf16>, vector<8x8x4xbf16>, vector<8x8x4xbf16>, vector<8x8x4xbf16>, vector<8x8x4xbf16> -> vector<8x8x36xbf16>
    %24 = vector.shape_cast %23 : vector<8x8x36xbf16> to vector<64x36xbf16>
    %c0_16 = arith.constant 0 : index
    %c0_17 = arith.constant 0 : index
    %25 = vector.load %arg2[%c0_16, %c0_17] : memref<36x128xbf16, #tpu.memory_space<vmem>>, vector<36x128xbf16>
    %cst = arith.constant dense<0.000000e+00> : vector<64x128xf32>
    %26 = tpu.matmul %24, %25, %cst {dimension_numbers = #tpu.dot_dimension_numbers<[1], [0], [0], [1], [0, 0, 1, 1], [], []>} : vector<64x36xbf16>, vector<36x128xbf16>, vector<64x128xf32> -> vector<64x128xf32>
    %c0_18 = arith.constant 0 : index
    %c0_19 = arith.constant 0 : index
    %c0_20 = arith.constant 0 : index
    %27 = vector.load %arg3[%c0_18, %c0_19, %c0_20] : memref<1x64x128xf32, #tpu.memory_space<vmem>>, vector<1x64x128xf32>
    %28 = vector.shape_cast %27 : vector<1x64x128xf32> to vector<64x128xf32>
    %29 = vector.shape_cast %26 : vector<64x128xf32> to vector<1x64x128xf32>
    tpu.vector_store %arg3[%c0_18, %c0_19, %c0_20], %29 {strides = array<i32>} : memref<1x64x128xf32, #tpu.memory_space<vmem>>, vector<1x64x128xf32>,
    return
  }
  func.func @transform_0(%arg0: i32) -> (i32, i32, i32, i32, i32) {
    %c0_i32 = arith.constant 0 : i32
    %c0_i32_0 = arith.constant 0 : i32
    %c0_i32_1 = arith.constant 0 : i32
    %c0_i32_2 = arith.constant 0 : i32
    %c0_i32_3 = arith.constant 0 : i32
    return %arg0, %c0_i32, %c0_i32_0, %c0_i32_1, %c0_i32_2 : i32, i32, i32, i32, i32
  }
  func.func @transform_1(%arg0: i32) -> (i32, i32) {
    %c0_i32 = arith.constant 0 : i32
    %c0_i32_0 = arith.constant 0 : i32
    %c0_i32_1 = arith.constant 0 : i32
    return %c0_i32, %c0_i32_0 : i32, i32
  }
  func.func @transform_2(%arg0: i32) -> (i32, i32, i32) {
    %c0_i32 = arith.constant 0 : i32
    %c0_i32_0 = arith.constant 0 : i32
    %c0_i32_1 = arith.constant 0 : i32
    return %arg0, %c0_i32, %c0_i32_0 : i32, i32, i32
  }
}

</mosaic_0001>

<bundles_post_ra>
// kernel: conv_fixed_padding.1
= control target key start
LH: loop header
LB: loop body
LE: loop exit
PB: predicated region body
PF: predicated region fallthrough
CT: control target
= control target key end

     0   :  { %s1056_s9 = smov 0   ;;  %s1451_s0 = inlined_call_operand.vmem [shape: bf16[2,4,9,16,4], index: 0, kind: input, shape index: {}]   ;;  %s1452_s1 = inlined_call_operand.vmem [shape: bf16[36,128], index: 1, kind: input, shape index: {}]   ;;  %s1453_s2 = inlined_call_operand.vmem [shape: f32[2,64,128], index: 2, kind: output, shape index: {}]  }
   0x1 LB: > { %s891_s10 = sadd.s32 4294967295, %s1031_s9   ;;  %p895_p0 = scmp.ge.s32.totalorder %s1031_s9, 1  ;;  %s1031_s9 = sphi %s1056_s9, %s12_s9  }
   0x2   : > { %p112_p1 = scmp.lt.s32.totalorder %s1031_s9, 3 }
   0x4   : > { %p113_p2 = pnand %p895_p0, %p112_p1 }
   0x5   : > { %p134_p3 = scmp.lt.s32.totalorder (!%p113_p2), %s891_s10, 1  ;;  %s1033_s15 = smov (!%p113_p2), 4  }
   0x6   : > { %116 = sbr.rel (%p113_p2) target bundleno = 443 (0x1bb), region = 28  ;;  %s1034_s16 = smov (!%p113_p2), 12  }
   0x7   : > { %s1035_s17 = smov (!%p113_p2), 8   ;;  %s1036_s18 = smov (!%p113_p2), 16  }
   0x8   : > { %s1037_s19 = smov (!%p113_p2), 20   ;;  %s1038_s20 = smov (!%p113_p2), 24  }
   0x9   : > { %s1039_s21 = smov (!%p113_p2), 28   ;;  %s1040_s22 = smov (!%p113_p2), 32  }
   0xb   : > { %s1455_s10 = smov (!%p134_p3, %s891_s10), 1  ;;  %vm598_vm0 = vcmask 31744   ;;  %vm623_vm1 = vcmask 64512   ;;  %vm640_vm2 = vcmask 97280   ;;  %vm795_vm3 = vcmask 1041408  }
   0xc   : > { %s1008_s11 = smul.u32 288, %s1455_s10  ;;  %vm657_vm4 = vcmask 130048   ;;  %vm674_vm5 = vcmask 162816   ;;  %vm691_vm6 = vcmask 195584   ;;  %vm708_vm7 = vcmask 228352   ;;  %s950_s29 = sshll.u32 %s1455_s10, 6 }
   0xd   : > { %vm725_vm8 = vcmask 261120   ;;  %vm782_vm9 = vcmask 293888   ;;  %s143_s4 = scalar_lea.vmem %s1453_s2, %s950_s29 }
   0xe   : > { %s1070_s14 = scalar_lea.vmem %s1451_s0, %s1008_s11 }
   0xf   : > { %v905_v0 = vld [vmem:[%s1070_s14 + $0x78] sm:$0xf]  ;;  %v903_v1 = vld [vmem:[%s1070_s14 + $0x68] sm:$0xf]  ;;  %v906_v2 = vld [vmem:[%s1070_s14 + $0x80] sm:$0xf] }
  0x10   : > { %v213_v3 = vunpack.c.l.b16 %v905_v0  ;;  %v211_v4 = vunpack.c.l.b16 %v903_v1  ;;  %v904_v5 = vld [vmem:[%s1070_s14 + $0x70] sm:$0xf]  ;;  %v1080_v7 = vld [vmem:[%s1070_s14 + $0x38] sm:$0xf]  ;;  %v160_v9 = vld [vmem:[%s1070_s14 + $0x3c] sm:$0xf]  ;;  %v214_v15 = vunpack.c.l.b16 %v906_v2 }
  0x11   : > { %v1077_v6 = vld [vmem:[%s1070_s14 + $0xb0] sm:$0xff]   ;;  %v1085_v10 = vunpack.c.l.b16 %v1080_v7  ;;  %v270_v16 = vunpack.c.l.b16 %v160_v9  ;;  %v1096_v17 = vld [vmem:[%s1070_s14 + $0x20] sm:$0xf]  ;;  %v154_v18 = vld [vmem:[%s1070_s14 + $0x24] sm:$0xf]  ;;  %v212_v19 = vunpack.c.l.b16 %v904_v5 }
  0x12   : > { %v976_v8 = vunpack.c.l.b16 %v1077_v6  ;;  %v1088_v11 = vld [vmem:[%s1070_s14 + $0x30] sm:$0xf]  ;;  %v158_v12 = vld [vmem:[%s1070_s14 + $0x34] sm:$0xf]  ;;  %v1091_v13 = vpack.c.b16 %v213_v3, %v213_v3  ;;  %v1093_v14 = vpack.c.b16 %v211_v4, %v211_v4  ;;  %v1103_v23 = vld [vmem:[%s1070_s14 + $0x28] sm:$0xf]  ;;  %v1112_v26 = vunpack.c.l.b16 %v1096_v17 }
  0x13   : > { %v1100_v21 = vunpack.c.l.b16 %v1088_v11  ;;  %v268_v22 = vunpack.c.l.b16 %v158_v12  ;;  %v156_v24 = vld [vmem:[%s1070_s14 + $0x2c] sm:$0xf]  ;;  %v278_v25 = vpack.c.b16 %v270_v16, %v1085_v10  ;;  %v264_v27 = vunpack.c.l.b16 %v154_v18  ;;  %v997_v50 = vld [vmem:[%s1070_s14 + $0xc0] sm:$0xff]   ;;  %v996_v51 = vld [vmem:[%s1070_s14 + $0xb8] sm:$0xff]  }
  0x14   : > { %v371_v20 = vpack.c.b16 %v976_v8, %v976_v8  ;;  %235 = vrot.lane.b32.xlu1 %v1091_v13, %s1033_s15  ;;  %231 = vrot.lane.b32.xlu0 %v1093_v14, %s1033_s15  ;;  %v1117_v29 = vunpack.c.l.b16 %v1103_v23  ;;  %v266_v30 = vunpack.c.l.b16 %v156_v24  ;;  %v1120_v32 = vpack.c.b16 %v214_v15, %v214_v15  ;;  %v998_v53 = vld [vmem:[%s1070_s14 + $0xc8] sm:$0xff]   ;;  %v929_v59 = vld [vmem:[%s1070_s14 + $0x100] sm:$0xf] }
  0x15   : > { %v277_v28 = vpack.c.b16 %v268_v22, %v1100_v21  ;;  %v275_v31 = vpack.c.b16 %v264_v27, %v1112_v26  ;;  %v1122_v33 = vpack.c.b16 %v212_v19, %v212_v19  ;;  %v331_v35 = vshll.u32 %v278_v25, 16  ;;  %v928_v60 = vld [vmem:[%s1070_s14 + $0xf8] sm:$0xf]  ;;  %v930_v62 = vld [vmem:[%s1070_s14 + $0x108] sm:$0xf] }
  0x16   : > { %383 = vrot.lane.b32.xlu2 %v371_v20, %s1034_s16  ;;  %v276_v34 = vpack.c.b16 %v266_v30, %v1117_v29  ;;  %v329_v41 = vshrl.u32 %v278_v25, 16  ;;  %v984_v54 = vunpack.c.l.b16 %v997_v50  ;;  %v980_v55 = vunpack.c.l.b16 %v996_v51  ;;  %v931_v5 = vld [vmem:[%s1070_s14 + $0x110] sm:$0xf] }
  0x17   : > { %v324_v36 = vshll.u32 %v277_v28, 16  ;;  %v308_v37 = vshrl.u32 %v275_v31, 16  ;;  %v310_v38 = vshll.u32 %v275_v31, 16  ;;  %v333_v42 = vrot.slane %v331_v35, 1 }
  0x18   : > { %v317_v40 = vshll.u32 %v276_v34, 16  ;;  %v322_v43 = vshrl.u32 %v277_v28, 16  ;;  %v315_v46 = vshrl.u32 %v276_v34, 16  ;;  %v988_v56 = vunpack.c.l.b16 %v998_v53 }
  0x19   : > { %v312_v39 = vrot.slane %v310_v38, 1  ;;  %v326_v44 = vrot.slane %v324_v36, 1  ;;  %v1133_v48 = vor.u32 %v333_v42, %v329_v41  ;;  %v373_v57 = vpack.c.b16 %v984_v54, %v984_v54  ;;  %v900_v41 = vld [vmem:[%s1070_s14 + $0x50] sm:$0xf] }
  0x1a   : > { %v319_v47 = vrot.slane %v317_v40, 1  ;;  %v372_v58 = vpack.c.b16 %v980_v55, %v980_v55  ;;  %v374_v61 = vpack.c.b16 %v988_v56, %v988_v56  ;;  %v404_v63 = vunpack.c.l.b16 %v929_v59  ;;  %v1191_v54 = vld [vmem:[%s1070_s14 + $0x10] sm:$0xf]  ;;  %v150_v55 = vld [vmem:[%s1070_s14 + $0x14] sm:$0xf] }
  0x1b   : > { %v1129_v45 = vor.u32 %v312_v39, %v308_v37  ;;  %v1135_v49 = vor.u32 %v326_v44, %v322_v43  ;;  %v403_v0 = vunpack.c.l.b16 %v928_v60  ;;  %v405_v1 = vunpack.c.l.b16 %v930_v62  ;;  %v1166_v37 = vld [vmem:[%s1070_s14 + $0x40] sm:$0xff]   ;;  %v901_v43 = vld [vmem:[%s1070_s14 + $0x58] sm:$0xf]  ;;  %v1195_v56 = vld [vmem:[%s1070_s14 + $0x8] sm:$0xf] }
  0x1c   : > { %237 = vrot.lane.b32.xlu1 %v1120_v32, %s1033_s15  ;;  %233 = vrot.lane.b32.xlu0 %v1122_v33, %s1033_s15  ;;  %v1139_v52 = vor.u32 %v319_v47, %v315_v46  ;;  %v412_v2 = vpack.c.b16 %v404_v63, %v404_v63  ;;  %v486_v4 = vshll.u32 %v1077_v6, 16  ;;  %v493_v9 = vshll.u32 %v996_v51, 16  ;;  %v1204_v60 = vld [vmem:[%s1070_s14 + $0x18] sm:$0xf] }
  0x1d   : > { %v411_v3 = vpack.c.b16 %v403_v0, %v403_v0  ;;  %v413_v8 = vpack.c.b16 %v405_v1, %v405_v1  ;;  %v484_v12 = vshrl.u32 %v1077_v6, 16  ;;  %v406_v16 = vunpack.c.l.b16 %v931_v5 }
  0x1e   : > { %343 = vrot.lane.b32.xlu2 %v1129_v45, %s1035_s17  ;;  %v488_v15 = vrot.slane %v486_v4, 1  ;;  %v491_v18 = vshrl.u32 %v996_v51, 16  ;;  %v495_v19 = vrot.slane %v493_v9, 1  ;;  %v507_v24 = vshll.u32 %v998_v53, 16 }
  0x1f   : > { %v414_v22 = vpack.c.b16 %v406_v16, %v406_v16  ;;  %v500_v25 = vshll.u32 %v997_v50, 16  ;;  %v505_v28 = vshrl.u32 %v998_v53, 16  ;;  %v498_v30 = vshrl.u32 %v997_v50, 16  ;;  %v902_v50 = vld [vmem:[%s1070_s14 + $0x60] sm:$0xf] }
  0x20   : > { %v489_v20 = vor.u32 %v488_v15, %v484_v12  ;;  %v496_v27 = vor.u32 %v495_v19, %v491_v18  ;;  %v509_v6 = vrot.slane %v507_v24, 1  ;;  %v533_v36 = vpack.c.b16 %v1117_v29, %v1117_v29  ;;  %v899_v29 = vld [vmem:[%s1070_s14 + $0x48] sm:$0xf] }
  0x21   : > { %v502_v31 = vrot.slane %v500_v25, 1  ;;  %v956_v38 = vunpack.c.l.b16 %v1166_v37  ;;  %v535_v39 = vpack.c.b16 %v1085_v10, %v1085_v10  ;;  %v534_v40 = vpack.c.b16 %v1100_v21, %v1100_v21 }
  0x22   : > { %v510_v34 = vor.u32 %v509_v6, %v505_v28  ;;  %v208_v44 = vunpack.c.l.b16 %v900_v41  ;;  %v207_v46 = vunpack.c.l.b16 %v899_v29  ;;  %v209_v10 = vunpack.c.l.b16 %v901_v43 }
  0x23   : > { %v503_v35 = vor.u32 %v502_v31, %v498_v30  ;;  %v536_v42 = vpack.c.b16 %v956_v38, %v956_v38  ;;  %v210_v53 = vunpack.c.l.b16 %v902_v50  ;;  %v1208_v62 = vunpack.c.l.b16 %v1191_v54  ;;  %v1244_v38 = vld [vmem:[%s1070_s14 + $0x90] sm:$0xff]  }
  0x24   : > { %349 = vrot.lane.b32.xlu1 %v1133_v48, %s1035_s17  ;;  %347 = vrot.lane.b32.xlu0 %v1135_v49, %s1035_s17  ;;  %v1182_v21 = vpack.c.b16 %v208_v44, %v208_v44  ;;  %v215_v47 = vpack.c.b16 %v207_v46, %v207_v46  ;;  %v1185_v51 = vpack.c.b16 %v209_v10, %v209_v10  ;;  %v260_v63 = vunpack.c.l.b16 %v150_v55  ;;  %v1259_v10 = vld [vmem:[%s1070_s14 + $0xa8] sm:$0xff]  }
  0x25   : > { %v1201_v59 = vpack.c.b16 %v210_v53, %v210_v53  ;;  %v1211_v0 = vunpack.c.l.b16 %v1195_v56  ;;  %v1215_v4 = vunpack.c.l.b16 %v1204_v60  ;;  %v576_v41 = vshrl.u32 %v1166_v37, 16 }
  0x26   : > { %345 = vrot.lane.b32.xlu2 %v1139_v52, %s1035_s17  ;;  %v273_v9 = vpack.c.b16 %v260_v63, %v1208_v62 }
  0x28   : > { %v294_v25 = vshrl.u32 %v273_v9, 16 }
  0x2c   : > { %387 = vrot.lane.b32.xlu1 %v373_v57, %s1034_s16  ;;  %385 = vrot.lane.b32.xlu0 %v372_v58, %s1034_s16  ;;  %v148_v57 = vld [vmem:[%s1070_s14 + $0xc] sm:$0xf]  ;;  %v951_v58 = vld [vmem:[%s1070_s14] sm:$0xff] }
  0x2d   : > { %v258_v1 = vunpack.c.l.b16 %v148_v57  ;;  %v280_v15 = vshrl.u32 %v951_v58, 16 }
  0x2e   : > { %389 = vrot.lane.b32.xlu2 %v374_v61, %s1034_s16  ;;  %v152_v61 = vld [vmem:[%s1070_s14 + $0x1c] sm:$0xf] }
  0x2f   : > { %v262_v5 = vunpack.c.l.b16 %v152_v61  ;;  %v272_v12 = vpack.c.b16 %v258_v1, %v1211_v0  ;;  %v925_v61 = vld [vmem:[%s1070_s14 + $0xe0] sm:$0xf] }
  0x31   : > { %v274_v18 = vpack.c.b16 %v262_v5, %v1215_v4  ;;  %v287_v28 = vshrl.u32 %v272_v12, 16 }
  0x33   : > { %v301_v6 = vshrl.u32 %v274_v18, 16 }
  0x34   : > { %425 = vrot.lane.b32.xlu1 %v412_v2, %s1036_s18  ;;  %423 = vrot.lane.b32.xlu0 %v411_v3, %s1036_s18  ;;  %v907_v2 = vld [vmem:[%s1070_s14 + $0x88] sm:$0xf]  ;;  %v282_v3 = vshll.u32 %v951_v58, 16 }
  0x35   : > { %v926_v58 = vld [vmem:[%s1070_s14 + $0xe8] sm:$0xf] }
  0x36   : > { %427 = vrot.lane.b32.xlu2 %v413_v8, %s1036_s18  ;;  %v554_v8 = vunpack.c.l.b16 %v907_v2  ;;  %v284_v16 = vrot.slane %v282_v3, 1  ;;  %v401_v1 = vunpack.c.l.b16 %v926_v58  ;;  %v927_v2 = vld [vmem:[%s1070_s14 + $0xf0] sm:$0xf]  ;;  %v400_v3 = vunpack.c.l.b16 %v925_v61 }
  0x37   : > { %v532_v61 = vpack.c.b16 %v1112_v26, %v1112_v26 }
  0x38   : > { %v555_v19 = vpack.c.b16 %v554_v8, %v554_v8  ;;  %v285_v24 = vor.u32 %v284_v16, %v280_v15  ;;  %v409_v15 = vpack.c.b16 %v401_v1, %v401_v1 }
  0x3c   : > { %519 = vrot.lane.b32.xlu1 %v489_v20, %s1037_s19  ;;  %429 = vrot.lane.b32.xlu0 %v414_v22, %s1036_s18  ;;  %v296_v20 = vshll.u32 %v273_v9, 16  ;;  %v289_v22 = vshll.u32 %v272_v12, 16  ;;  %v402_v9 = vunpack.c.l.b16 %v927_v2 }
  0x3e   : > { %521 = vrot.lane.b32.xlu2 %v496_v27, %s1037_s19  ;;  %v298_v27 = vrot.slane %v296_v20, 1 }
  0x40   : > { %v1230_v31 = vor.u32 %v298_v27, %v294_v25 }
  0x44   : > { %525 = vrot.lane.b32.xlu1 %v510_v34, %s1037_s19  ;;  %523 = vrot.lane.b32.xlu0 %v503_v35, %s1037_s19 }
  0x46   : > { %545 = vrot.lane.b32.xlu2 %v533_v36, %s1038_s20  ;;  %v578_v36 = vshll.u32 %v1166_v37, 16  ;;  %v972_v37 = vunpack.c.l.b16 %v1259_v10 }
  0x48   : > { %v580_v29 = vrot.slane %v578_v36, 1  ;;  %v370_v53 = vpack.c.b16 %v972_v37, %v972_v37 }
  0x4a   : > { %v581_v44 = vor.u32 %v580_v29, %v576_v41 }
  0x4c   : > { %549 = vrot.lane.b32.xlu1 %v535_v39, %s1038_s20  ;;  %547 = vrot.lane.b32.xlu0 %v534_v40, %s1038_s20  ;;  %v1247_v39 = vld [vmem:[%s1070_s14 + $0x98] sm:$0xff]   ;;  %v960_v40 = vunpack.c.l.b16 %v1244_v38 }
  0x4d   : > { %v465_v20 = vshll.u32 %v1247_v39, 16 }
  0x4e   : > { %551 = vrot.lane.b32.xlu2 %v536_v42, %s1038_s20  ;;  %v964_v42 = vunpack.c.l.b16 %v1247_v39  ;;  %v367_v43 = vpack.c.b16 %v960_v40, %v960_v40 }
  0x4f   : > { %v467_v27 = vrot.slane %v465_v20, 1  ;;  %v952_v20 = vld [vmem:[%s1452_s1] sm:$0xff] }
  0x54   : > { %225 = vrot.lane.b32.xlu1 %v1182_v21, %s1033_s15  ;;  %223 = vrot.lane.b32.xlu0 %v215_v47, %s1033_s15  ;;  %v924_v47 = vld [vmem:[%s1070_s14 + $0xd8] sm:$0xf] }
  0x55   : > { %v399_v50 = vunpack.c.l.b16 %v924_v47 }
  0x56   : > { %227 = vrot.lane.b32.xlu2 %v1185_v51, %s1033_s15 }
  0x57   : > { %v407_v63 = vpack.c.b16 %v399_v50, %v399_v50 }
  0x5c   : > { %564 = vrot.lane.b32.xlu1 %v1122_v33, %s1039_s21  ;;  %229 = vrot.lane.b32.xlu0 %v1201_v59, %s1033_s15  ;;  %v303_v33 = vshll.u32 %v274_v18, 16  ;;  %v408_v18 = vpack.c.b16 %v400_v3, %v400_v3 }
  0x5e   : > { %566 = vrot.lane.b32.xlu2 %v1091_v13, %s1039_s21  ;;  %v291_v13 = vrot.slane %v289_v22, 1  ;;  %v305_v30 = vrot.slane %v303_v33, 1  ;;  %v458_v22 = vshll.u32 %v1244_v38, 16  ;;  %v410_v33 = vpack.c.b16 %v402_v9, %v402_v9 }
  0x60   : > { %v1232_v34 = vor.u32 %v291_v13, %v287_v28  ;;  %v1234_v35 = vor.u32 %v305_v30, %v301_v6  ;;  %v456_v28 = vshrl.u32 %v1244_v38, 16  ;;  %v460_v13 = vrot.slane %v458_v22, 1 }
  0x62   : > { %v461_v29 = vor.u32 %v460_v13, %v456_v28 }
  0x64   : > { %570 = vrot.lane.b32.xlu1 %v555_v19, %s1039_s21  ;;  %568 = vrot.lane.b32.xlu0 %v1120_v32, %s1039_s21 }
  0x66   : > { %335 = vrot.lane.b32.xlu2 %v285_v24, %s1035_s17 }
  0x6c   : > { %339 = vrot.lane.b32.xlu1 %v1230_v31, %s1035_s17  ;;  %337 = vrot.lane.b32.xlu0 %v1232_v34, %s1035_s17 }
  0x6e   : > { %341 = vrot.lane.b32.xlu2 %v1234_v35, %s1035_s17 }
  0x70   : > { %v384_v32 = vpop.permute.xlu2 %383 }
  0x74   : > { %592 = vrot.lane.b32.xlu1 %v1135_v49, %s1040_s22  ;;  %590 = vrot.lane.b32.xlu0 %v1139_v52, %s1040_s22  ;;  %v993_v49 = vld [vmem:[%s1070_s14 + $0xa0] sm:$0xff]   ;;  %v368_v52 = vpack.c.b16 %v964_v42, %v964_v42 }
  0x75   : > { %v472_v25 = vshll.u32 %v993_v49, 16  ;;  %v470_v36 = vshrl.u32 %v993_v49, 16 }
  0x76   : > { %594 = vrot.lane.b32.xlu2 %v1133_v48, %s1040_s22  ;;  %v968_v48 = vunpack.c.l.b16 %v993_v49 }
  0x77   : > { %v474_v40 = vrot.slane %v472_v25, 1 }
  0x78   : > { %v344_v46 = vpop.permute.xlu2 %343  ;;  %v369_v55 = vpack.c.b16 %v968_v48, %v968_v48 }
  0x7c   : > { %375 = vrot.lane.b32.xlu1 %v367_v43, %s1034_s16  ;;  %596 = vrot.lane.b32.xlu0 %v581_v44, %s1040_s22  ;;  %v479_v43 = vshll.u32 %v1259_v10, 16  ;;  %v475_v44 = vor.u32 %v474_v40, %v470_v36 }
  0x7e   : > { %377 = vrot.lane.b32.xlu2 %v368_v52, %s1034_s16  ;;  %v481_v49 = vrot.slane %v479_v43, 1 }
  0x80   : > { %v346_v57 = vpop.permute.xlu2 %345 }
  0x84   : > { %381 = vrot.lane.b32.xlu1 %v370_v53, %s1034_s16  ;;  %379 = vrot.lane.b32.xlu0 %v369_v55, %s1034_s16 }
  0x86   : > { %v236_v5 = vpop.permute.xlu1 %235  ;;  %v232_v8 = vpop.permute.xlu0 %231  ;;  %415 = vrot.lane.b32.xlu2 %v407_v63, %s1036_s18 }
  0x87   : > { %v613_v12 = vsel %vm598_vm0, %v1096_v17, %v232_v8  ;;  %v463_v17 = vshrl.u32 %v1247_v39, 16 }
  0x88   : > { %v633_v16 = vsel %vm623_vm1, %v613_v12, %v344_v46  ;;  %v390_v19 = vpop.permute.xlu2 %389  ;;  %v477_v46 = vshrl.u32 %v1259_v10, 16 }
  0x89   : > { %v1279_v24 = vsel %vm640_vm2, %v633_v16, %v384_v32  ;;  %v468_v41 = vor.u32 %v467_v27, %v463_v17  ;;  %v145_v16 = vld [vmem:[%s1070_s14] sm:$0xf] }
  0x8a   : > { %v482_v50 = vor.u32 %v481_v49, %v477_v46 }
  0x8c   : > { %419 = vrot.lane.b32.xlu1 %v409_v15, %s1036_s18  ;;  %417 = vrot.lane.b32.xlu0 %v408_v18, %s1036_s18 }
  0x8e   : > { %v238_v6 = vpop.permute.xlu1 %237  ;;  %v234_v30 = vpop.permute.xlu0 %233  ;;  %421 = vrot.lane.b32.xlu2 %v410_v33, %s1036_s18 }
  0x8f   : > { %v616_v32 = vsel %vm598_vm0, %v1103_v23, %v234_v30  ;;  %v622_v38 = vsel %vm598_vm0, %v1080_v7, %v238_v6  ;;  %v619_v23 = vsel %vm598_vm0, %v1088_v11, %v236_v5  ;;  %v529_v7 = vpack.c.b16 %v1211_v0, %v1211_v0 }
  0x90   : > { %v1288_v42 = vpop.permute.xlu2 %427  ;;  %v635_v39 = vsel %vm623_vm1, %v616_v32, %v346_v57  ;;  %v530_v11 = vpack.c.b16 %v1208_v62, %v1208_v62  ;;  %v531_v62 = vpack.c.b16 %v1215_v4, %v1215_v4 }
  0x94   : > { %513 = vrot.lane.b32.xlu1 %v468_v41, %s1037_s19  ;;  %511 = vrot.lane.b32.xlu0 %v461_v29, %s1037_s19 }
  0x96   : > { %v350_v52 = vpop.permute.xlu1 %349  ;;  %v348_v47 = vpop.permute.xlu0 %347  ;;  %515 = vrot.lane.b32.xlu2 %v475_v44, %s1037_s19 }
  0x97   : > { %v639_v37 = vsel %vm623_vm1, %v622_v38, %v350_v52  ;;  %v637_v48 = vsel %vm623_vm1, %v619_v23, %v348_v47 }
  0x98   : > { %v1304_v53 = vpop.permute.xlu2 %521  ;;  %v1307_v10 = vsel %vm640_vm2, %v639_v37, %v390_v19 }
  0x9c   : > { %537 = vrot.lane.b32.xlu1 %v529_v7, %s1038_s20  ;;  %517 = vrot.lane.b32.xlu0 %v482_v50, %s1037_s19 }
  0x9e   : > { %v388_v55 = vpop.permute.xlu1 %387  ;;  %v386_v57 = vpop.permute.xlu0 %385  ;;  %539 = vrot.lane.b32.xlu2 %v530_v11, %s1038_s20 }
  0x9f   : > { %v1315_v58 = vsel %vm640_vm2, %v637_v48, %v388_v55  ;;  %v1318_v0 = vsel %vm640_vm2, %v635_v39, %v386_v57 }
  0xa0   : > { %v1324_v63 = vpop.permute.xlu2 %545  ;;  %v671_v47 = vsel %vm657_vm4, %v1315_v58, %v1288_v42 }
  0xa4   : > { %543 = vrot.lane.b32.xlu1 %v532_v61, %s1038_s20  ;;  %541 = vrot.lane.b32.xlu0 %v531_v62, %s1038_s20 }
  0xa6   : > { %v426_v1 = vpop.permute.xlu1 %425  ;;  %v424_v2 = vpop.permute.xlu0 %423  ;;  %556 = vrot.lane.b32.xlu2 %v1182_v21, %s1039_s21 }
  0xa7   : > { %v669_v29 = vsel %vm657_vm4, %v1318_v0, %v426_v1  ;;  %v667_v39 = vsel %vm657_vm4, %v1279_v24, %v424_v2 }
  0xa8   : > { %v1330_v3 = vpop.permute.xlu2 %551 }
  0xac   : > { %560 = vrot.lane.b32.xlu1 %v1201_v59, %s1039_s21  ;;  %558 = vrot.lane.b32.xlu0 %v1185_v51, %s1039_s21 }
  0xae   : > { %v520_v26 = vpop.permute.xlu1 %519  ;;  %v1336_v4 = vpop.permute.xlu0 %429  ;;  %562 = vrot.lane.b32.xlu2 %v1093_v14, %s1039_s21  ;;  %v746_v14 = vld [vmem:[%s1452_s1 + $0x10] sm:$0x3] }
  0xaf   : > { %v776_v59 = vunpack.c.l.b16 %v746_v14  ;;  %v684_v44 = vsel %vm674_vm5, %v667_v39, %v520_v26  ;;  %v673_v11 = vsel %vm657_vm4, %v1307_v10, %v1336_v4 }
  0xb0   : > { %v228_v5 = vpop.permute.xlu2 %227  ;;  %v701_v38 = vsel %vm691_vm6, %v684_v44, %v1324_v63 }
  0xb1   : > { %v779_v9 = vpack.c.b16 %v776_v59, %v776_v59  ;;  %v607_v36 = vsel %vm598_vm0, %v1191_v54, %v228_v5  ;;  %v686_v54 = vsel %vm674_vm5, %v669_v29, %v1304_v53 }
  0xb3   : > { %v797_v12 = vsel %vm795_vm3, %v779_v9, 0 }
  0xb4   : > { %584 = vrot.lane.b32.xlu1 %v1230_v31, %s1040_s22  ;;  %582 = vrot.lane.b32.xlu0 %v1232_v34, %s1040_s22 }
  0xb5   : > { %1000 = vmatpush.bf16.msra.mxu2 %v797_v12  ;;  %1001 = vmatpush.bf16.msra.mxu3 %v797_v12 }
  0xb6   : > { %v1344_v21 = vpop.permute.xlu1 %525  ;;  %v1346_v8 = vpop.permute.xlu0 %523  ;;  %586 = vrot.lane.b32.xlu2 %v1234_v35, %s1040_s22  ;;  %v953_v35 = vld [vmem:[%s1452_s1 + $0x8] sm:$0xff]  ;;  %804 = vmatpush.bf16.msra.mxu0 %v797_v12 }
  0xb7   : > { %999 = vmatpush.bf16.msra.mxu1 %v797_v12  ;;  %v688_v7 = vsel %vm674_vm5, %v671_v47, %v1346_v8  ;;  %v690_v42 = vsel %vm674_vm5, %v673_v11, %v1344_v21 }
  0xb8   : > { %v567_v51 = vpop.permute.xlu2 %566  ;;  %v707_v0 = vsel %vm691_vm6, %v690_v42, %v1330_v3 }
  0xb9   : > { %1003 = vmatpush.bf16.msra.mxu2 %v953_v35  ;;  %1004 = vmatpush.bf16.msra.mxu3 %v953_v35 }
  0xba   : > { %805 = vmatpush.bf16.msra.mxu0 %v953_v35 }
  0xbb   : > { %1002 = vmatpush.bf16.msra.mxu1 %v953_v35 }
  0xbc   : > { %588 = vrot.lane.b32.xlu0 %v1129_v45, %s1040_s22 }
  0xbd   : > { %1006 = vmatpush.bf16.msra.mxu2 %v952_v20  ;;  %1007 = vmatpush.bf16.msra.mxu3 %v952_v20 }
  0xbe   : > { %v1355_v31 = vpop.permute.xlu1 %549  ;;  %v548_v34 = vpop.permute.xlu0 %547  ;;  %806 = vmatpush.bf16.msra.mxu0 %v952_v20 }
  0xbf   : > { %1005 = vmatpush.bf16.msra.mxu1 %v952_v20  ;;  %v705_v55 = vsel %vm691_vm6, %v688_v7, %v1355_v31 }
  0xc0   : > { %v336_v15 = vpop.permute.xlu2 %335 }
  0xc6   : > { %v226_v45 = vpop.permute.xlu1 %225  ;;  %v224_v18 = vpop.permute.xlu0 %223 }
  0xc7   : > { %v601_v19 = vsel %vm598_vm0, %v145_v16, %v224_v18  ;;  %v604_v40 = vsel %vm598_vm0, %v1195_v56, %v226_v45  ;;  %v703_v56 = vsel %vm691_vm6, %v686_v54, %v548_v34 }
  0xc8   : > { %v1366_v22 = vsel %vm623_vm1, %v601_v19, %v336_v15  ;;  %v342_v33 = vpop.permute.xlu2 %341  ;;  %v720_v49 = vsel %vm708_vm7, %v703_v56, %v567_v51 }
  0xce   : > { %v565_v25 = vpop.permute.xlu1 %564  ;;  %v230_v17 = vpop.permute.xlu0 %229 }
  0xcf   : > { %v610_v27 = vsel %vm598_vm0, %v1204_v60, %v230_v17  ;;  %v718_v23 = vsel %vm708_vm7, %v701_v38, %v565_v25 }
  0xd0   : > { %v1371_v28 = vsel %vm623_vm1, %v610_v27, %v342_v33  ;;  %v595_v30 = vpop.permute.xlu2 %594 }
  0xd6   : > { %v571_v13 = vpop.permute.xlu1 %570  ;;  %v569_v6 = vpop.permute.xlu0 %568 }
  0xd7   : > { %v722_v57 = vsel %vm708_vm7, %v705_v55, %v569_v6  ;;  %v724_v10 = vsel %vm708_vm7, %v707_v0, %v571_v13 }
  0xd8   : > { %v378_v46 = vpop.permute.xlu2 %377  ;;  %v739_v61 = vsel %vm725_vm8, %v722_v57, %v595_v30 }
  0xd9   : > { %v761_v26 = vunpack.c.l.b16 %v739_v61 }
  0xde   : > { %v340_v32 = vpop.permute.xlu1 %339  ;;  %v338_v41 = vpop.permute.xlu0 %337 }
  0xdf   : > { %v1380_v60 = vsel %vm623_vm1, %v607_v36, %v340_v32  ;;  %v627_v43 = vsel %vm623_vm1, %v604_v40, %v338_v41 }
  0xe0   : > { %v416_v62 = vpop.permute.xlu2 %415  ;;  %v644_v33 = vsel %vm640_vm2, %v627_v43, %v378_v46 }
  0xe6   : > { %v593_v52 = vpop.permute.xlu1 %592  ;;  %v591_v24 = vpop.permute.xlu0 %590 }
  0xe7   : > { %v737_v37 = vsel %vm725_vm8, %v720_v49, %v593_v52  ;;  %v735_v48 = vsel %vm725_vm8, %v718_v23, %v591_v24 }
  0xe8   : > { %v760_v50 = vunpack.c.l.b16 %v737_v37  ;;  %v759_v53 = vunpack.c.l.b16 %v735_v48  ;;  %v422_v51 = vpop.permute.xlu2 %421 }
  0xea   : > { %v765_v58 = vpack.c.b16 %v760_v50, %v759_v53 }
  0xec   : > { %946 = vmatmul.msk.bf16.vlgmr.msra.gmra.mxu2 %vm782_vm9, %v765_v58 }
  0xee   : > { %v376_v63 = vpop.permute.xlu1 %375  ;;  %v597_v1 = vpop.permute.xlu0 %596 }
  0xef   : > { %v741_v2 = vsel %vm725_vm8, %v724_v10, %v597_v1  ;;  %v642_v18 = vsel %vm640_vm2, %v1366_v22, %v376_v63 }
  0xf0   : > { %v762_v4 = vunpack.c.l.b16 %v741_v2  ;;  %v516_v3 = vpop.permute.xlu2 %515  ;;  %v659_v17 = vsel %vm657_vm4, %v642_v18, %v416_v62 }
  0xf2   : > { %v766_v5 = vpack.c.b16 %v762_v4, %v761_v26 }
  0xf4   : > { %947 = vmatmul.msk.bf16.vlgmr.msra.gmra.mxu3 %vm782_vm9, %v766_v5 }
  0xf6   : > { %v382_v21 = vpop.permute.xlu1 %381  ;;  %v380_v8 = vpop.permute.xlu0 %379 }
  0xf7   : > { %v646_v36 = vsel %vm640_vm2, %v1380_v60, %v380_v8  ;;  %v648_v32 = vsel %vm640_vm2, %v1371_v28, %v382_v21 }
  0xf8   : > { %v540_v9 = vpop.permute.xlu2 %539  ;;  %v665_v46 = vsel %vm657_vm4, %v648_v32, %v422_v51 }
  0xfe   : > { %v420_v14 = vpop.permute.xlu1 %419  ;;  %v418_v59 = vpop.permute.xlu0 %417 }
  0xff   : > { %v661_v27 = vsel %vm657_vm4, %v644_v33, %v418_v59  ;;  %v663_v22 = vsel %vm657_vm4, %v646_v36, %v420_v14 }
 0x100   : > { %v557_v15 = vpop.permute.xlu2 %556  ;;  %v680_v56 = vsel %vm674_vm5, %v663_v22, %v516_v3 }
 0x106   : > { %v514_v31 = vpop.permute.xlu1 %513  ;;  %v512_v34 = vpop.permute.xlu0 %511 }
 0x107   : > { %v678_v13 = vsel %vm674_vm5, %v661_v27, %v514_v31  ;;  %v676_v6 = vsel %vm674_vm5, %v659_v17, %v512_v34 }
 0x108   : > { %v563_v25 = vpop.permute.xlu2 %562  ;;  %v695_v40 = vsel %vm691_vm6, %v678_v13, %v540_v9 }
 0x10e   : > { %v538_v12 = vpop.permute.xlu1 %537  ;;  %v518_v35 = vpop.permute.xlu0 %517 }
 0x10f   : > { %v693_v30 = vsel %vm691_vm6, %v676_v6, %v538_v12  ;;  %v682_v28 = vsel %vm674_vm5, %v665_v46, %v518_v35 }
 0x110   : > { %v710_v41 = vsel %vm708_vm7, %v693_v30, %v557_v15  ;;  %v587_v52 = vpop.permute.xlu2 %586 }
 0x116   : > { %v544_v16 = vpop.permute.xlu1 %543  ;;  %v542_v45 = vpop.permute.xlu0 %541 }
 0x117   : > { %v697_v49 = vsel %vm691_vm6, %v680_v56, %v542_v45  ;;  %v699_v47 = vsel %vm691_vm6, %v682_v28, %v544_v16 }
 0x118   : > { %v716_v48 = vsel %vm708_vm7, %v699_v47, %v563_v25 }
 0x11e   : > { %v561_v19 = vpop.permute.xlu1 %560  ;;  %v559_v20 = vpop.permute.xlu0 %558 }
 0x11f   : > { %v712_v29 = vsel %vm708_vm7, %v695_v40, %v559_v20  ;;  %v714_v23 = vsel %vm708_vm7, %v697_v49, %v561_v19 }
 0x120   : > { %v731_v37 = vsel %vm725_vm8, %v714_v23, %v587_v52 }
 0x121   : > { %v757_v53 = vunpack.c.l.b16 %v731_v37 }
 0x126   : > { %v585_v43 = vpop.permute.xlu1 %584  ;;  %v583_v39 = vpop.permute.xlu0 %582 }
 0x127   : > { %v729_v44 = vsel %vm725_vm8, %v712_v29, %v585_v43  ;;  %v727_v54 = vsel %vm725_vm8, %v710_v41, %v583_v39 }
 0x128   : > { %v756_v60 = vunpack.c.l.b16 %v729_v44  ;;  %v755_v38 = vunpack.c.l.b16 %v727_v54 }
 0x12a   : > { %v763_v24 = vpack.c.b16 %v756_v60, %v755_v38 }
 0x12c   : > { %944 = vmatmul.msk.bf16.vlgmr.msra.gmra.mxu0 %vm782_vm9, %v763_v24 }
 0x12e   : > { %v589_v7 = vpop.permute.xlu0 %588 }
 0x12f   : > { %v733_v50 = vsel %vm725_vm8, %v716_v48, %v589_v7 }
 0x130   : > { %v758_v11 = vunpack.c.l.b16 %v733_v50 }
 0x132   : > { %v764_v55 = vpack.c.b16 %v758_v11, %v757_v53 }
 0x134   : > { %945 = vmatmul.msk.bf16.vlgmr.msra.gmra.mxu1 %vm782_vm9, %v764_v55 }
 0x16f   : > { %v818_v42 = vpop.f32.mrf.mxu2 }
 0x170   : > { %832 = vst [vmem:[%s143_s4 + $0x20] sm:$0xff] %v818_v42 }
 0x177   : > { %v820_v57 = vpop.f32.mrf.mxu2  ;;  %v823_v58 = vpop.f32.mrf.mxu3 }
 0x178   : > { %833 = vst [vmem:[%s143_s4 + $0x28] sm:$0xff] %v820_v57 }
 0x179   : > { %834 = vst [vmem:[%s143_s4 + $0x30] sm:$0xff] %v823_v58 }
 0x17f   : > { %v825_v0 = vpop.f32.mrf.mxu3 }
 0x180   : > { %835 = vst [vmem:[%s143_s4 + $0x38] sm:$0xff] %v825_v0 }
 0x1a9   : > { %v808_v61 = vpop.f32.mrf.mxu0 }
 0x1aa   : > { %828 = vst [vmem:[%s143_s4] sm:$0xff] %v808_v61 }
 0x1b1   : > { %v810_v62 = vpop.f32.mrf.mxu0  ;;  %v813_v10 = vpop.f32.mrf.mxu1 }
 0x1b2   : > { %829 = vst [vmem:[%s143_s4 + $0x8] sm:$0xff] %v810_v62 }
 0x1b3   : > { %830 = vst [vmem:[%s143_s4 + $0x10] sm:$0xff] %v813_v10 }
 0x1b9   : > { %v815_v63 = vpop.f32.mrf.mxu1 }
 0x1ba   : > { %831 = vst [vmem:[%s143_s4 + $0x18] sm:$0xff] %v815_v63 }
 0x1bb PF: > { %s12_s9 = sadd.s32 1, %s1031_s9  }
 0x1bc   : > { %p9_p4 = scmp.ge.s32.totalorder %s12_s9, 4  }
 0x1be   :  { %11 = sbr.rel (!%p9_p4) target bundleno = 1 (0x1), region = 61 }

</bundles_post_ra>
